<compile_context>
chip_gen: v7x
topology: tpu7x:2x2x1
jax: 0.10.0
libtpu: 0.0.40
codegen_flags: <defaults>
</compile_context>

<pallas_src>
import jax
import jax.numpy as jnp
from jax.experimental import pallas as pl
from jax.experimental.pallas import tpu as pltpu

LANE = 128      # TPU lane width
SUBLANE = 8     # f32 sublane width


def _round_up(x, m):
    return pl.cdiv(x, m) * m


def actor_mlp_kernel(state_ref, w1_ref, b1_ref, w2_ref, b2_ref,
                     w3_ref, b3_ref, out_ref):
    """Fused 3-layer MLP on one batch tile.

    bf16 matmul operands -> f32 accumulate; bias add / ReLU in f32.
    """
    x = state_ref[...]                                              # (TM, S) bf16

    # fc1 + relu
    h1 = jnp.dot(x, w1_ref[...], preferred_element_type=jnp.float32)
    h1 = jnp.maximum(h1 + b1_ref[...], 0.0)                         # f32

    # fc2 + relu
    h2 = jnp.dot(h1.astype(jnp.bfloat16), w2_ref[...],
                 preferred_element_type=jnp.float32)
    h2 = jnp.maximum(h2 + b2_ref[...], 0.0)                         # f32

    # fc3 (logits, no activation) — lane-dense (TM, 128·k) store
    logits = jnp.dot(h2.astype(jnp.bfloat16), w3_ref[...],
                     preferred_element_type=jnp.float32)
    out_ref[...] = (logits + b3_ref[...]).astype(out_ref.dtype)


def actor_forward(state, w1, b1, w2, b2, w3, b3, *, tm=512):
    """Pallas wrapper.

    Weights are pre-transposed to (in, out); biases are (1, out).
    Returns f32 logits of shape (batch, action_size).
    """
    batch, state_size = state.shape
    hidden = w1.shape[1]
    action_size = w3.shape[1]

    # ---- lane-dense output padding (action_size -> multiple of 128) ----
    out_pad = int(_round_up(action_size, LANE))
    w3p = jnp.zeros((hidden, out_pad), jnp.float32).at[:, :action_size].set(w3)
    b3p = jnp.zeros((1, out_pad), jnp.float32).at[:, :action_size].set(b3)

    # ---- batch tiling ---------------------------------------------------
    tm_eff = int(min(tm, _round_up(batch, SUBLANE)))
    padded_batch = int(_round_up(batch, tm_eff))
    if padded_batch != batch:
        state = jnp.pad(state, ((0, padded_batch - batch), (0, 0)))
    grid = (padded_batch // tm_eff,)

    # bf16 matmul operands; biases stay f32.
    state_b = state.astype(jnp.bfloat16)
    w1_b = w1.astype(jnp.bfloat16)
    w2_b = w2.astype(jnp.bfloat16)
    w3_b = w3p.astype(jnp.bfloat16)

    # Weights/biases: same block for every grid step -> stay resident in VMEM.
    resident = lambda shape: pl.BlockSpec(shape, lambda i: (0,) * len(shape))

    flops = 2 * padded_batch * (state_size * hidden
                                + hidden * hidden
                                + hidden * out_pad)
    bytes_accessed = (state_b.size * 2
                      + (w1_b.size + w2_b.size + w3_b.size) * 2
                      + (b1.size + b2.size + b3p.size) * 4
                      + padded_batch * out_pad * 4)
    cost = pl.CostEstimate(flops=flops, transcendentals=0,
                           bytes_accessed=bytes_accessed)

    out = pl.pallas_call(
        actor_mlp_kernel,
        out_shape=jax.ShapeDtypeStruct((padded_batch, out_pad), jnp.float32),
        grid=grid,
        in_specs=[
            pl.BlockSpec((tm_eff, state_size), lambda i: (i, 0)),
            resident(w1_b.shape), resident(b1.shape),
            resident(w2_b.shape), resident(b2.shape),
            resident(w3_b.shape), resident(b3p.shape),
        ],
        out_specs=pl.BlockSpec((tm_eff, out_pad), lambda i: (i, 0)),
        compiler_params=pltpu.CompilerParams(
            dimension_semantics=("parallel",)),
        cost_estimate=cost,
    )(state_b, w1_b, b1, w2_b, b2, w3_b, b3p)

    # Drop batch / lane padding.
    return out[:batch, :action_size]


def init_linear(key, in_features, out_features):
    """nn.Linear-style uniform(-1/sqrt(in), 1/sqrt(in)) init.
    Weight is returned pre-transposed to (in, out); bias as (1, out)."""
    kw, kb = jax.random.split(key)
    bound = 1.0 / jnp.sqrt(jnp.float32(in_features))
    w = jax.random.uniform(kw, (in_features, out_features), jnp.float32,
                           minval=-bound, maxval=bound)
    b = jax.random.uniform(kb, (1, out_features), jnp.float32,
                           minval=-bound, maxval=bound)
    return w, b


def reference_forward(state, w1, b1, w2, b2, w3, b3):
    """Pure-JAX reference with the same bf16-operand / f32-accumulate math."""
    h1 = jnp.dot(state.astype(jnp.bfloat16), w1.astype(jnp.bfloat16),
                 preferred_element_type=jnp.float32)
    h1 = jnp.maximum(h1 + b1, 0.0)
    h2 = jnp.dot(h1.astype(jnp.bfloat16), w2.astype(jnp.bfloat16),
                 preferred_element_type=jnp.float32)
    h2 = jnp.maximum(h2 + b2, 0.0)
    return jnp.dot(h2.astype(jnp.bfloat16), w3.astype(jnp.bfloat16),
                   preferred_element_type=jnp.float32) + b3


if __name__ == "__main__":
    # Small, module-consistent shapes.
    batch = 2
    state_size = 16
    hidden_size = 32
    action_size = 8

    key = jax.random.PRNGKey(0)
    k_state, k1, k2, k3, k_big = jax.random.split(key, 5)

    state = jax.random.normal(k_state, (batch, state_size), jnp.float32)
    w1, b1 = init_linear(k1, state_size, hidden_size)
    w2, b2 = init_linear(k2, hidden_size, hidden_size)
    w3, b3 = init_linear(k3, hidden_size, action_size)

    logits = actor_forward(state, w1, b1, w2, b2, w3, b3)
    jax.block_until_ready(logits)
    assert logits.shape == (batch, action_size)

    # Check against a bf16-matched JAX reference (tight) ...
    ref = reference_forward(state, w1, b1, w2, b2, w3, b3)
    assert jnp.allclose(logits, ref, atol=5e-3, rtol=5e-3), "mismatch vs bf16 reference"
    # ... and against full-f32 math (loose, bf16 rounding).
    ref_f32 = jnp.maximum(state @ w1 + b1, 0.0)
    ref_f32 = jnp.maximum(ref_f32 @ w2 + b2, 0.0)
    ref_f32 = ref_f32 @ w3 + b3
    assert jnp.allclose(logits, ref_f32, atol=5e-2, rtol=5e-2), "mismatch vs f32 reference"

    # Larger, non-tile-multiple batch exercises the grid + batch-padding path.
    big_batch = 300
    big_state = jax.random.normal(k_big, (big_batch, state_size), jnp.float32)
    big_logits = actor_forward(big_state, w1, b1, w2, b2, w3, b3, tm=128)
    jax.block_until_ready(big_logits)
    big_ref = reference_forward(big_state, w1, b1, w2, b2, w3, b3)
    assert big_logits.shape == (big_batch, action_size)
    assert jnp.allclose(big_logits, big_ref, atol=5e-3, rtol=5e-3), "grid-path mismatch"

    # TODO(synk): evaluate()/get_action() (masked-categorical sampling) are
    # thin jnp ops on top of these logits and are left outside the kernel.
    print("KERNEL_OK")
</pallas_src>

<mosaic_0001>
module attributes {stable_mosaic.version = 11 : i64} {
  func.func @actor_mlp_kernel(%arg0: i32, %arg1: memref<8x16xbf16, #tpu.memory_space<vmem>>, %arg2: memref<16x32xbf16, #tpu.memory_space<vmem>>, %arg3: memref<1x32xf32, #tpu.memory_space<vmem>>, %arg4: memref<32x32xbf16, #tpu.memory_space<vmem>>, %arg5: memref<1x32xf32, #tpu.memory_space<vmem>>, %arg6: memref<32x128xbf16, #tpu.memory_space<vmem>>, %arg7: memref<1x128xf32, #tpu.memory_space<vmem>>, %arg8: memref<8x128xf32, #tpu.memory_space<vmem>>) attributes {dimension_semantics = [#tpu.dimension_semantics<parallel>], iteration_bounds = array<i64: 1>, scalar_prefetch = 0 : i64, scratch_operands = 0 : i64, tpu.core_type = #tpu.core_type<tc>, window_params = [{transform_indices = @transform_0, window_bounds = array<i64: 8, 16>}, {pipeline_mode = #tpu.pipeline_mode<synchronous>, transform_indices = @transform_1, window_bounds = array<i64: 16, 32>}, {pipeline_mode = #tpu.pipeline_mode<synchronous>, transform_indices = @transform_2, window_bounds = array<i64: 1, 32>}, {pipeline_mode = #tpu.pipeline_mode<synchronous>, transform_indices = @transform_3, window_bounds = array<i64: 32, 32>}, {pipeline_mode = #tpu.pipeline_mode<synchronous>, transform_indices = @transform_4, window_bounds = array<i64: 1, 32>}, {pipeline_mode = #tpu.pipeline_mode<synchronous>, transform_indices = @transform_5, window_bounds = array<i64: 32, 128>}, {pipeline_mode = #tpu.pipeline_mode<synchronous>, transform_indices = @transform_6, window_bounds = array<i64: 1, 128>}, {transform_indices = @transform_7, window_bounds = array<i64: 8, 128>}]} {
    %c0 = arith.constant 0 : index
    %c0_0 = arith.constant 0 : index
    %0 = vector.load %arg1[%c0, %c0_0] : memref<8x16xbf16, #tpu.memory_space<vmem>>, vector<8x16xbf16>
    %c0_1 = arith.constant 0 : index
    %c0_2 = arith.constant 0 : index
    %1 = vector.load %arg2[%c0_1, %c0_2] : memref<16x32xbf16, #tpu.memory_space<vmem>>, vector<16x32xbf16>
    %cst = arith.constant dense<0.000000e+00> : vector<8x32xf32>
    %2 = tpu.matmul %0, %1, %cst {dimension_numbers = #tpu.dot_dimension_numbers<[1], [0], [0], [1], [0, 0, 1, 1], [], []>} : vector<8x16xbf16>, vector<16x32xbf16>, vector<8x32xf32> -> vector<8x32xf32>
    %c0_3 = arith.constant 0 : index
    %c0_4 = arith.constant 0 : index
    %3 = vector.load %arg3[%c0_3, %c0_4] : memref<1x32xf32, #tpu.memory_space<vmem>>, vector<1x32xf32>
    %4 = vector.broadcast %3 : vector<1x32xf32> to vector<8x32xf32>
    %5 = arith.addf %2, %4 : vector<8x32xf32>
    %cst_5 = arith.constant 0.000000e+00 : f32
    %6 = vector.broadcast %cst_5 : f32 to vector<8x32xf32>
    %7 = arith.maximumf %5, %6 : vector<8x32xf32>
    %8 = arith.truncf %7 : vector<8x32xf32> to vector<8x32xbf16>
    %c0_6 = arith.constant 0 : index
    %c0_7 = arith.constant 0 : index
    %9 = vector.load %arg4[%c0_6, %c0_7] : memref<32x32xbf16, #tpu.memory_space<vmem>>, vector<32x32xbf16>
    %cst_8 = arith.constant dense<0.000000e+00> : vector<8x32xf32>
    %10 = tpu.matmul %8, %9, %cst_8 {dimension_numbers = #tpu.dot_dimension_numbers<[1], [0], [0], [1], [0, 0, 1, 1], [], []>} : vector<8x32xbf16>, vector<32x32xbf16>, vector<8x32xf32> -> vector<8x32xf32>
    %c0_9 = arith.constant 0 : index
    %c0_10 = arith.constant 0 : index
    %11 = vector.load %arg5[%c0_9, %c0_10] : memref<1x32xf32, #tpu.memory_space<vmem>>, vector<1x32xf32>
    %12 = vector.broadcast %11 : vector<1x32xf32> to vector<8x32xf32>
    %13 = arith.addf %10, %12 : vector<8x32xf32>
    %cst_11 = arith.constant 0.000000e+00 : f32
    %14 = vector.broadcast %cst_11 : f32 to vector<8x32xf32>
    %15 = arith.maximumf %13, %14 : vector<8x32xf32>
    %16 = arith.truncf %15 : vector<8x32xf32> to vector<8x32xbf16>
    %c0_12 = arith.constant 0 : index
    %c0_13 = arith.constant 0 : index
    %17 = vector.load %arg6[%c0_12, %c0_13] : memref<32x128xbf16, #tpu.memory_space<vmem>>, vector<32x128xbf16>
    %cst_14 = arith.constant dense<0.000000e+00> : vector<8x128xf32>
    %18 = tpu.matmul %16, %17, %cst_14 {dimension_numbers = #tpu.dot_dimension_numbers<[1], [0], [0], [1], [0, 0, 1, 1], [], []>} : vector<8x32xbf16>, vector<32x128xbf16>, vector<8x128xf32> -> vector<8x128xf32>
    %c0_15 = arith.constant 0 : index
    %c0_16 = arith.constant 0 : index
    %19 = vector.load %arg7[%c0_15, %c0_16] : memref<1x128xf32, #tpu.memory_space<vmem>>, vector<1x128xf32>
    %20 = vector.broadcast %19 : vector<1x128xf32> to vector<8x128xf32>
    %21 = arith.addf %18, %20 : vector<8x128xf32>
    %c0_17 = arith.constant 0 : index
    %c0_18 = arith.constant 0 : index
    %22 = vector.load %arg8[%c0_17, %c0_18] : memref<8x128xf32, #tpu.memory_space<vmem>>, vector<8x128xf32>
    tpu.vector_store %arg8[%c0_17, %c0_18], %21 {strides = array<i32>} : memref<8x128xf32, #tpu.memory_space<vmem>>, vector<8x128xf32>,
    return
  }
  func.func @transform_0(%arg0: i32) -> (i32, i32) {
    %c0_i32 = arith.constant 0 : i32
    %c0_i32_0 = arith.constant 0 : i32
    return %arg0, %c0_i32 : i32, i32
  }
  func.func @transform_1(%arg0: i32) -> (i32, i32) {
    %c0_i32 = arith.constant 0 : i32
    %c0_i32_0 = arith.constant 0 : i32
    %c0_i32_1 = arith.constant 0 : i32
    return %c0_i32, %c0_i32_0 : i32, i32
  }
  func.func @transform_2(%arg0: i32) -> (i32, i32) {
    %c0_i32 = arith.constant 0 : i32
    %c0_i32_0 = arith.constant 0 : i32
    %c0_i32_1 = arith.constant 0 : i32
    return %c0_i32, %c0_i32_0 : i32, i32
  }
  func.func @transform_3(%arg0: i32) -> (i32, i32) {
    %c0_i32 = arith.constant 0 : i32
    %c0_i32_0 = arith.constant 0 : i32
    %c0_i32_1 = arith.constant 0 : i32
    return %c0_i32, %c0_i32_0 : i32, i32
  }
  func.func @transform_4(%arg0: i32) -> (i32, i32) {
    %c0_i32 = arith.constant 0 : i32
    %c0_i32_0 = arith.constant 0 : i32
    %c0_i32_1 = arith.constant 0 : i32
    return %c0_i32, %c0_i32_0 : i32, i32
  }
  func.func @transform_5(%arg0: i32) -> (i32, i32) {
    %c0_i32 = arith.constant 0 : i32
    %c0_i32_0 = arith.constant 0 : i32
    %c0_i32_1 = arith.constant 0 : i32
    return %c0_i32, %c0_i32_0 : i32, i32
  }
  func.func @transform_6(%arg0: i32) -> (i32, i32) {
    %c0_i32 = arith.constant 0 : i32
    %c0_i32_0 = arith.constant 0 : i32
    %c0_i32_1 = arith.constant 0 : i32
    return %c0_i32, %c0_i32_0 : i32, i32
  }
  func.func @transform_7(%arg0: i32) -> (i32, i32) {
    %c0_i32 = arith.constant 0 : i32
    %c0_i32_0 = arith.constant 0 : i32
    return %arg0, %c0_i32 : i32, i32
  }
}

</mosaic_0001>

<bundles_post_ra>
// kernel: tpu_custom_call.1
= control target key start
LH: loop header
LB: loop body
LE: loop exit
PB: predicated region body
PF: predicated region fallthrough
CT: control target
= control target key end

     0   :  { %12 = vsyncpa [#allocation3], 0  ;;  %s546_s0 = inlined_call_operand.hbm [shape: bf16[8,16], index: 0, kind: input, shape index: {}]   ;;  %s547_s1 = inlined_call_operand.hbm [shape: bf16[16,32], index: 1, kind: input, shape index: {}]   ;;  %s548_s2 = inlined_call_operand.vmem [shape: f32[1,32], index: 2, kind: input, shape index: {}]   ;;  %s549_s3 = inlined_call_operand.hbm [shape: bf16[32,32], index: 3, kind: input, shape index: {}]   ;;  %s550_s4 = inlined_call_operand.vmem [shape: f32[1,32], index: 4, kind: input, shape index: {}]   ;;  %s551_s5 = inlined_call_operand.vmem [shape: bf16[32,128], index: 5, kind: input, shape index: {}]   ;;  %s552_s6 = inlined_call_operand.vmem [shape: f32[1,128], index: 6, kind: input, shape index: {}]   ;;  %s553_s7 = inlined_call_operand.hbm [shape: f32[8,128], index: 7, kind: output, shape index: {}]  }
   0x1   :  { %13 = vsyncpa [#allocation6], 0 }
   0x2   :  { %14 = vsyncpa [#allocation4], 0  ;;  %s429_s24 = smov [#allocation5]   ;;  %s335_s28 = scalar_lea.hbm %s547_s1, 128 }
   0x3   :  { %s30_s25 = sshll.u32 %s429_s24, 4  ;;  %p336_p0 = scmp.ne.s32.totalorder %s547_s1, %s335_s28  ;;  %s31_s25 = int_to_ptr.vmem [resolvable:$true] %s30_s25 }
   0x4   :  { %p339_p1 = scmp.lt.u32.totalorder %s335_s28, %s547_s1 }
   0x6   :  { %p341_p2 = pnand %p339_p1, %p336_p0 }
   0x8   :  { %344 = shalt.err (!%p341_p2)
}
   0x9   :  { %s345_s10 = scalar_lea.vmem %s31_s25, 128  ;;  %p350_p4 = scmp.lt.s32.totalorder %s31_s25, %s31_s25 }
   0xa   :  { %p346_p3 = scmp.ne.s32.totalorder %s31_s25, %s345_s10  ;;  %p351_p5 = scmp.lt.s32.totalorder %s345_s10, %s345_s10 }
   0xc   :  { %p352_p6 = por %p351_p5, %p350_p4 }
   0xe   :  { %p353_p7 = pnand %p352_p6, %p346_p3 }
  0x10   :  { %356 = shalt.err (!%p353_p7)
}
  0x11   :  { %s430_s11 = smov 64   ;;  %s431_s12 = smov 4  }
  0x12   :  { %36 = dma.hbm_to_vmem [thread:$0]  %s547_s1, 128, %s31_s25, [#allocation6], %s430_s11, %s430_s11, %s431_s12  }
  0x13   :  { %s432_s15 = smov [#allocation2]   ;;  %s433_s17 = smov [#allocation7]  }
  0x14   :  { %s21_s16 = sshll.u32 %s432_s15, 4  ;;  %s44_s18 = sshll.u32 %s433_s17, 4  ;;  %s22_s16 = int_to_ptr.vmem [resolvable:$true] %s21_s16  ;;  %s45_s18 = int_to_ptr.vmem [resolvable:$true] %s44_s18 }
  0x15   :  { %s357_s21 = scalar_lea.hbm %s546_s0, 64 }
  0x16   :  { %p358_p8 = scmp.ne.s32.totalorder %s546_s0, %s357_s21  ;;  %p361_p9 = scmp.lt.u32.totalorder %s357_s21, %s546_s0 }
  0x18   :  { %p363_p10 = pnand %p361_p9, %p358_p8 }
  0x1a   :  { %366 = shalt.err (!%p363_p10)
}
  0x1b   :  { %s367_s1 = scalar_lea.vmem %s22_s16, 64  ;;  %p372_p12 = scmp.lt.s32.totalorder %s22_s16, %s22_s16 }
  0x1c   :  { %p368_p11 = scmp.ne.s32.totalorder %s22_s16, %s367_s1  ;;  %p373_p13 = scmp.lt.s32.totalorder %s367_s1, %s367_s1 }
  0x1e   :  { %p374_p0 = por %p373_p13, %p372_p12 }
  0x20   :  { %p375_p1 = pnand %p374_p0, %p368_p11 }
  0x22   :  { %378 = shalt.err (!%p375_p1)
}
  0x23   :  { %24 = dma.hbm_to_vmem [thread:$0]  %s546_s0, 64, %s22_s16, [#allocation3]  }
  0x24   :  { %s379_s30 = scalar_lea.hbm %s549_s3, 256 }
  0x25   :  { %p380_p2 = scmp.ne.s32.totalorder %s549_s3, %s379_s30  ;;  %p383_p3 = scmp.lt.u32.totalorder %s379_s30, %s549_s3 }
  0x27   :  { %p385_p4 = pnand %p383_p3, %p380_p2 }
  0x29   :  { %388 = shalt.err (!%p385_p4)
}
  0x2a   :  { %s389_s14 = scalar_lea.vmem %s45_s18, 256  ;;  %p394_p6 = scmp.lt.s32.totalorder %s45_s18, %s45_s18 }
  0x2b   :  { %p390_p5 = scmp.ne.s32.totalorder %s45_s18, %s389_s14  ;;  %p395_p7 = scmp.lt.s32.totalorder %s389_s14, %s389_s14 }
  0x2d   :  { %p396_p8 = por %p395_p7, %p394_p6 }
  0x2f   :  { %p397_p9 = pnand %p396_p8, %p390_p5 }
  0x31   :  { %400 = shalt.err (!%p397_p9)
}
  0x32   :  { %50 = dma.hbm_to_vmem [thread:$0]  %s549_s3, 256, %s45_s18, [#allocation6], %s430_s11, %s430_s11, %s431_s12  }
  0x33   :  { %423 = dma.done.wait [#allocation3], 64  }
  0x34   :  { %424 = vsyncadd [#allocation3], 4294967232 }
  0x35   :  { %425 = dma.done.wait [#allocation6], 384  }
  0x36   :  { %426 = vsyncadd [#allocation6], 4294966912  ;;  %v434_v0 = vmov 0.0   ;;  %vm435_vm0 = vmmov 0   ;;  %v330_v1 = vld [vmem:[#allocation5] sm:$0xff]   ;;  %vm83_vm1 = vcmask 130048  }
  0x37   :  { %300 = vmatprep.subr.bf16.mxu0 %v434_v0  ;;  %302 = vmatprep.mubr.msk.bf16.mxu0 %vm435_vm0, %v434_v0  ;;  %v67_v2 = vld [vmem:[#allocation2] sm:$0xf]  ;;  %v331_v3 = vld [vmem:[#allocation7] sm:$0xff]   ;;  %v332_v4 = vld [vmem:[#allocation7 + $0x8] sm:$0xff]   ;;  %vm152_vm2 = vcmask 261120   ;;  %s436_s22 = smov [#allocation8]  }
  0x38   :  { %306 = vmatprep.subr.bf16.mxu1 %v434_v0  ;;  %310 = vmatprep.mubr.msk.bf16.mxu1 %vm435_vm0, %v434_v0  ;;  %v333_v5 = vld [vmem:[%s551_s5] sm:$0xff]   ;;  %v334_v14 = vld [vmem:[%s551_s5 + $0x8] sm:$0xff]   ;;  %s271_s23 = sshll.u32 %s436_s22, 4  ;;  %s272_s23 = int_to_ptr.vmem [resolvable:$true] %s271_s23 }
  0x39   :  { %301 = vmatpush3.bf16.msra.mxu0 %v330_v1  ;;  %307 = vmatpush3.bf16.msra.mxu1 %v331_v3  ;;  %v281_v6 = vld [vmem:[%s548_s2] ss:$0 sm:$0xff]  ;;  %p406_p11 = scmp.lt.s32.totalorder %s272_s23, %s272_s23 }
  0x3a   :  { %314 = vmatprep.subr.bf16.mxu0 %v434_v0  ;;  %308 = vmatprep.subr.bf16.mxu1 %v434_v0  ;;  %v284_v15 = vld [vmem:[%s550_s4] ss:$0 sm:$0xff]  ;;  %s401_s4 = scalar_lea.vmem %s272_s23, 128 }
  0x3b   :  { %v288_v23 = vld [vmem:[%s552_s6] ss:$0 sm:$0xff]  ;;  %p402_p10 = scmp.ne.s32.totalorder %s272_s23, %s401_s4  ;;  %p407_p12 = scmp.lt.s32.totalorder %s401_s4, %s401_s4 }
  0x3c   :  { %303 = vmatmul.mubr.msk.bf16.vlgmr.msra.gmra.mrb[0].mxu0 %vm83_vm1, %v67_v2 }
  0x3d   :  { %318 = vmatprep.mubr.msk.bf16.mxu0 %vm435_vm0, %v434_v0  ;;  %309 = vmatpush3.bf16.msra.mxu1 %v332_v4  ;;  %p408_p13 = por %p407_p12, %p406_p11 }
  0x3e   :  { %315 = vmatpush3.bf16.msra.mxu0 %v333_v5 }
  0x3f   :  { %316 = vmatprep.subr.bf16.mxu0 %v434_v0  ;;  %p409_p0 = pnand %p408_p13, %p402_p10 }
  0x42   :  { %317 = vmatpush3.bf16.msra.mxu0 %v334_v14 }
 0x10f   :  { %v121_v7 = vpop.f32.mrb[0].mxu0 }
 0x110   :  { %v122_v8 = vadd.f32 %v281_v6, %v121_v7  ;;  %v304_v9 = vpop.f32.mrb[1].mxu0 }
 0x111   :  { %v124_v10 = vpop.f32.mrb[2].mxu0 }
 0x112   :  { %v127_v11 = vmax.f32 %v122_v8, 0.0  ;;  %v305_v12 = vpop.f32.mrb[3].mxu0 }
 0x114   :  { %v128_v13 = vpack.c.bf16 %v127_v11, %v127_v11 }
 0x116   :  { %311 = vmatmul.mubr.msk.bf16.vlgmr.msra.gmra.mrb[0].mxu1 %vm152_vm2, %v128_v13 }
 0x1e9   :  { %v190_v16 = vpop.f32.mrb[0].mxu1 }
 0x1ea   :  { %v191_v17 = vadd.f32 %v284_v15, %v190_v16  ;;  %v312_v18 = vpop.f32.mrb[1].mxu1 }
 0x1eb   :  { %v193_v19 = vpop.f32.mrb[2].mxu1 }
 0x1ec   :  { %v196_v20 = vmax.f32 %v191_v17, 0.0  ;;  %v313_v21 = vpop.f32.mrb[3].mxu1 }
 0x1ee   :  { %v197_v22 = vpack.c.bf16 %v196_v20, %v196_v20 }
 0x1f0   :  { %319 = vmatmul.mubr.msk.bf16.vlgmr.msra.gmra.mrb[4].mxu0 %vm152_vm2, %v197_v22 }
 0x2c3   :  { %v258_v24 = vpop.f32.mrb[4].mxu0 }
 0x2c4   :  { %v259_v25 = vadd.f32 %v288_v23, %v258_v24  ;;  %v320_v26 = vpop.f32.mrb[5].mxu0 }
 0x2c5   :  { %v261_v27 = vpop.f32.mrb[6].mxu0 }
 0x2c6   :  { %264 = vst [vmem:[#allocation8] sm:$0xff] %v259_v25  ;;  %v321_v28 = vpop.f32.mrb[7].mxu0 }
 0x2c7   :  { %412 = shalt.err (!%p409_p0)
}
 0x2c8   :  { %s413_s6 = scalar_lea.hbm %s553_s7, 128 }
 0x2c9   :  { %p414_p1 = scmp.ne.s32.totalorder %s553_s7, %s413_s6  ;;  %p417_p2 = scmp.lt.u32.totalorder %s413_s6, %s553_s7 }
 0x2cb   :  { %p419_p3 = pnand %p417_p2, %p414_p1 }
 0x2cd   :  { %422 = shalt.err (!%p419_p3)
}
 0x2ce   :  { %274 = dma.vmem_to_hbm [thread:$0]  %s272_s23, 128, %s553_s7, [#allocation4]  }
 0x2cf   :  { %427 = dma.done.wait [#allocation4], 128  }
 0x2d0   :  { %428 = vsyncadd [#allocation4], 4294967168 }
 0x2d1   :  { %278 = vsyncpa [#allocation3], 1 }
 0x2d2   :  { %279 = vsyncpa [#allocation6], 1 }
 0x2d3   :  { %280 = vsyncpa [#allocation4], 1 }

</bundles_post_ra>
